<compile_context>
chip_gen: v5e
topology: v5e:2x2
jax: 0.10.0
libtpu: 0.0.40
codegen_flags: <defaults>
</compile_context>

<pallas_src>
import functools

import jax
import jax.numpy as jnp
from jax.experimental import pallas as pl
from jax.experimental.pallas import tpu as pltpu

FRAMES = 64
DIMS = [FRAMES, 32, 16, 8, 4, 2, 1]   # Linear chain 64->32->16->8->4->2->1
BN_EPS = 1e-5


# ----------------------------- Pallas kernel ------------------------------- #
def _disc_kernel(x_ref,
                 w1, a1, w2, a2, w3, a3, w4, a4, w5, a5, w6, a6,
                 o_ref, *, mxu_dtype):
    """Fused MLP in transposed layout: activations are (features, batch_tile)."""
    h = x_ref[...]                                     # (64, tb) f32

    def block(h, w_ref, a_ref, relu=True):
        # Linear on the MXU: (d_out, d_in) @ (d_in, tb) -> (d_out, tb).
        # Only the matmul operands are cast to `mxu_dtype` (bf16 by default on
        # v6e/v7x); accumulation and all elementwise work stay in f32
        # (v5e VPU/EUP have no bf16).
        z = jnp.dot(w_ref[...].astype(mxu_dtype), h.astype(mxu_dtype),
                    preferred_element_type=jnp.float32)
        # Linear bias + BatchNorm(eval) pre-folded into one scale/shift:
        # a_ref[:, 0] = scale, a_ref[:, 1] = shift  (identity scale for layer 6).
        z = z * a_ref[:, 0:1] + a_ref[:, 1:2]
        return jnp.maximum(z, 0.0) if relu else z

    h = block(h, w1, a1)                 # (32, tb)
    h = block(h, w2, a2)                 # (16, tb)
    h = block(h, w3, a3)                 # (8, tb)
    h = block(h, w4, a4)                 # (4, tb)
    h = block(h, w5, a5)                 # (2, tb)
    z = block(h, w6, a6, relu=False)     # (1, tb)

    # Sigmoid via tanh (goes to the EUP slot) instead of a VALU f32 divide.
    o_ref[...] = 0.5 * (jnp.tanh(0.5 * z) + 1.0)


# ------------------------------- Wrapper ------------------------------------ #
def _pick_tb(B):
    """Large, lane-dense batch tiles; keep >= 2 grid steps for big batches so
    the 'parallel' grid axis can shard across v7x's two TensorCores."""
    if B <= 1024:
        return B
    for cand in (2048, 1024, 512, 256, 128):
        if B % cand == 0 and B // cand >= 2:
            return cand
    return B


def discriminator_forward(x, packed_params, *, tb=None, mxu_dtype=jnp.bfloat16):
    """x: (B, FRAMES) f32.  packed_params: [w1, a1, ..., w6, a6] with
    w_i: (d_out, d_in) and a_i: (d_out, 2) = [scale, shift] columns."""
    B, F = x.shape
    assert F == FRAMES
    if tb is None:
        tb = _pick_tb(B)
    assert B % tb == 0
    assert tb == B or tb % 128 == 0, "batch tile must be lane-dense"

    xt = x.T                                            # (FRAMES, B): batch on lanes

    in_specs = [pl.BlockSpec((FRAMES, tb), lambda i: (0, i))]
    for p in packed_params:
        # Constant block index: fetched once and reused across grid steps.
        in_specs.append(pl.BlockSpec(p.shape, lambda i: (0, 0)))

    out = pl.pallas_call(
        functools.partial(_disc_kernel, mxu_dtype=mxu_dtype),
        out_shape=jax.ShapeDtypeStruct((1, B), jnp.float32),
        grid=(B // tb,),
        in_specs=in_specs,
        out_specs=pl.BlockSpec((1, tb), lambda i: (0, i)),   # lane-dense store
        compiler_params=pltpu.CompilerParams(
            dimension_semantics=("parallel",)),
    )(xt, *packed_params)
    return out.reshape(B, 1)


# ------------------------- Deterministic param init ------------------------- #
def init_raw_params(key):
    """Synthetic, deterministic PyTorch-style params (Linear + BN eval stats)."""
    raw = []
    for li in range(6):
        d_in, d_out = DIMS[li], DIMS[li + 1]
        key, kw, kb, kg, kbe, km, kv = jax.random.split(key, 7)
        bound = 1.0 / jnp.sqrt(jnp.float32(d_in))
        w = jax.random.uniform(kw, (d_out, d_in), jnp.float32, -bound, bound)
        b = jax.random.uniform(kb, (d_out,), jnp.float32, -bound, bound)
        layer = {"w": w, "b": b}
        if li < 5:
            layer["gamma"] = jax.random.uniform(kg, (d_out,), jnp.float32, 0.5, 1.5)
            layer["beta"] = 0.1 * jax.random.normal(kbe, (d_out,), jnp.float32)
            layer["mean"] = 0.1 * jax.random.normal(km, (d_out,), jnp.float32)
            layer["var"] = jax.random.uniform(kv, (d_out,), jnp.float32, 0.5, 1.5)
        raw.append(layer)
    return raw


def pack_params(raw):
    """Fold Linear bias + eval-mode BN into one per-feature (scale, shift)."""
    packed = []
    for li, p in enumerate(raw):
        if li < 5:
            scale = p["gamma"] / jnp.sqrt(p["var"] + BN_EPS)
            shift = p["b"] * scale + (p["beta"] - p["mean"] * scale)  # bias folded
        else:
            scale = jnp.ones_like(p["b"])       # last layer: no BN
            shift = p["b"]
        packed += [p["w"], jnp.stack([scale, shift], axis=1)]         # (d_out, 2)
    return packed


def reference_forward(x, raw):
    """Pure-JAX reference matching the PyTorch module (BN in eval mode)."""
    h = x
    for li, p in enumerate(raw):
        z = h @ p["w"].T + p["b"]
        if li < 5:
            z = (z - p["mean"]) / jnp.sqrt(p["var"] + BN_EPS) * p["gamma"] + p["beta"]
            h = jnp.maximum(z, 0.0)
        else:
            h = jax.nn.sigmoid(z)
    return h


# ---------------------------------- Main ------------------------------------ #
if __name__ == "__main__":
    key = jax.random.PRNGKey(0)
    k_params, k_x1, k_x2 = jax.random.split(key, 3)

    raw = init_raw_params(k_params)
    packed = pack_params(raw)

    # Small-shape check (B=8): full-batch tile, exact-f32 matmul operands.
    B = 8
    x = jax.random.normal(k_x1, (B, FRAMES), jnp.float32)
    ref = reference_forward(x, raw)

    out_f32 = jax.block_until_ready(
        discriminator_forward(x, packed, mxu_dtype=jnp.float32))
    assert out_f32.shape == (B, 1)
    assert jnp.allclose(out_f32, ref, atol=1e-4, rtol=1e-4), (out_f32, ref)

    # Same inputs with the perf config (bf16 MXU operands, f32 accumulate).
    out_bf16 = jax.block_until_ready(discriminator_forward(x, packed))
    assert jnp.allclose(out_bf16, ref, atol=1e-2, rtol=1e-2), (out_bf16, ref)

    # Larger batch to exercise the tiled, lane-dense, grid>1 ("parallel") path.
    B2 = 512
    x2 = jax.random.normal(k_x2, (B2, FRAMES), jnp.float32)
    ref2 = reference_forward(x2, raw)
    out2 = jax.block_until_ready(discriminator_forward(x2, packed, tb=256))
    assert out2.shape == (B2, 1)
    assert jnp.allclose(out2, ref2, atol=1e-2, rtol=1e-2), (out2, ref2)

    print("KERNEL_OK")
</pallas_src>

<mosaic_0001>
module attributes {stable_mosaic.version = 11 : i64} {
  func.func @_disc_kernel(%arg0: i32, %arg1: memref<64x8xf32, #tpu.memory_space<vmem>>, %arg2: memref<32x64xf32, #tpu.memory_space<vmem>>, %arg3: memref<32x2xf32, #tpu.memory_space<vmem>>, %arg4: memref<16x32xf32, #tpu.memory_space<vmem>>, %arg5: memref<16x2xf32, #tpu.memory_space<vmem>>, %arg6: memref<8x16xf32, #tpu.memory_space<vmem>>, %arg7: memref<8x2xf32, #tpu.memory_space<vmem>>, %arg8: memref<4x8xf32, #tpu.memory_space<vmem>>, %arg9: memref<4x2xf32, #tpu.memory_space<vmem>>, %arg10: memref<2x4xf32, #tpu.memory_space<vmem>>, %arg11: memref<2x2xf32, #tpu.memory_space<vmem>>, %arg12: memref<1x2xf32, #tpu.memory_space<vmem>>, %arg13: memref<1x2xf32, #tpu.memory_space<vmem>>, %arg14: memref<1x8xf32, #tpu.memory_space<vmem>>) attributes {dimension_semantics = [#tpu.dimension_semantics<parallel>], iteration_bounds = array<i64: 1>, scalar_prefetch = 0 : i64, scratch_operands = 0 : i64, tpu.core_type = #tpu.core_type<tc>, window_params = [{transform_indices = @transform_0, window_bounds = array<i64: 64, 8>}, {pipeline_mode = #tpu.pipeline_mode<synchronous>, transform_indices = @transform_1, window_bounds = array<i64: 32, 64>}, {pipeline_mode = #tpu.pipeline_mode<synchronous>, transform_indices = @transform_2, window_bounds = array<i64: 32, 2>}, {pipeline_mode = #tpu.pipeline_mode<synchronous>, transform_indices = @transform_3, window_bounds = array<i64: 16, 32>}, {pipeline_mode = #tpu.pipeline_mode<synchronous>, transform_indices = @transform_4, window_bounds = array<i64: 16, 2>}, {pipeline_mode = #tpu.pipeline_mode<synchronous>, transform_indices = @transform_5, window_bounds = array<i64: 8, 16>}, {pipeline_mode = #tpu.pipeline_mode<synchronous>, transform_indices = @transform_6, window_bounds = array<i64: 8, 2>}, {pipeline_mode = #tpu.pipeline_mode<synchronous>, transform_indices = @transform_7, window_bounds = array<i64: 4, 8>}, {pipeline_mode = #tpu.pipeline_mode<synchronous>, transform_indices = @transform_8, window_bounds = array<i64: 4, 2>}, {pipeline_mode = #tpu.pipeline_mode<synchronous>, transform_indices = @transform_9, window_bounds = array<i64: 2, 4>}, {pipeline_mode = #tpu.pipeline_mode<synchronous>, transform_indices = @transform_10, window_bounds = array<i64: 2, 2>}, {pipeline_mode = #tpu.pipeline_mode<synchronous>, transform_indices = @transform_11, window_bounds = array<i64: 1, 2>}, {pipeline_mode = #tpu.pipeline_mode<synchronous>, transform_indices = @transform_12, window_bounds = array<i64: 1, 2>}, {transform_indices = @transform_13, window_bounds = array<i64: 1, 8>}]} {
    %c0 = arith.constant 0 : index
    %c0_0 = arith.constant 0 : index
    %0 = vector.load %arg1[%c0, %c0_0] : memref<64x8xf32, #tpu.memory_space<vmem>>, vector<64x8xf32>
    %c0_1 = arith.constant 0 : index
    %c0_2 = arith.constant 0 : index
    %1 = vector.load %arg2[%c0_1, %c0_2] : memref<32x64xf32, #tpu.memory_space<vmem>>, vector<32x64xf32>
    %cst = arith.constant dense<0.000000e+00> : vector<32x8xf32>
    %2 = tpu.matmul %1, %0, %cst {dimension_numbers = #tpu.dot_dimension_numbers<[1], [0], [0], [1], [0, 0, 1, 1], [], []>} : vector<32x64xf32>, vector<64x8xf32>, vector<32x8xf32> -> vector<32x8xf32>
    %c0_3 = arith.constant 0 : index
    %c0_4 = arith.constant 0 : index
    %3 = vector.load %arg3[%c0_3, %c0_4] : memref<32x2xf32, #tpu.memory_space<vmem>>, vector<32x1xf32>
    %4 = vector.broadcast %3 : vector<32x1xf32> to vector<32x8xf32>
    %5 = arith.mulf %2, %4 : vector<32x8xf32>
    %c0_5 = arith.constant 0 : index
    %c1 = arith.constant 1 : index
    %6 = vector.load %arg3[%c0_5, %c1] : memref<32x2xf32, #tpu.memory_space<vmem>>, vector<32x1xf32>
    %7 = vector.broadcast %6 : vector<32x1xf32> to vector<32x8xf32>
    %8 = arith.addf %5, %7 : vector<32x8xf32>
    %cst_6 = arith.constant 0.000000e+00 : f32
    %9 = vector.broadcast %cst_6 : f32 to vector<32x8xf32>
    %10 = arith.maximumf %8, %9 : vector<32x8xf32>
    %c0_7 = arith.constant 0 : index
    %c0_8 = arith.constant 0 : index
    %11 = vector.load %arg4[%c0_7, %c0_8] : memref<16x32xf32, #tpu.memory_space<vmem>>, vector<16x32xf32>
    %cst_9 = arith.constant dense<0.000000e+00> : vector<16x8xf32>
    %12 = tpu.matmul %11, %10, %cst_9 {dimension_numbers = #tpu.dot_dimension_numbers<[1], [0], [0], [1], [0, 0, 1, 1], [], []>} : vector<16x32xf32>, vector<32x8xf32>, vector<16x8xf32> -> vector<16x8xf32>
    %c0_10 = arith.constant 0 : index
    %c0_11 = arith.constant 0 : index
    %13 = vector.load %arg5[%c0_10, %c0_11] : memref<16x2xf32, #tpu.memory_space<vmem>>, vector<16x1xf32>
    %14 = vector.broadcast %13 : vector<16x1xf32> to vector<16x8xf32>
    %15 = arith.mulf %12, %14 : vector<16x8xf32>
    %c0_12 = arith.constant 0 : index
    %c1_13 = arith.constant 1 : index
    %16 = vector.load %arg5[%c0_12, %c1_13] : memref<16x2xf32, #tpu.memory_space<vmem>>, vector<16x1xf32>
    %17 = vector.broadcast %16 : vector<16x1xf32> to vector<16x8xf32>
    %18 = arith.addf %15, %17 : vector<16x8xf32>
    %cst_14 = arith.constant 0.000000e+00 : f32
    %19 = vector.broadcast %cst_14 : f32 to vector<16x8xf32>
    %20 = arith.maximumf %18, %19 : vector<16x8xf32>
    %c0_15 = arith.constant 0 : index
    %c0_16 = arith.constant 0 : index
    %21 = vector.load %arg6[%c0_15, %c0_16] : memref<8x16xf32, #tpu.memory_space<vmem>>, vector<8x16xf32>
    %cst_17 = arith.constant dense<0.000000e+00> : vector<8x8xf32>
    %22 = tpu.matmul %21, %20, %cst_17 {dimension_numbers = #tpu.dot_dimension_numbers<[1], [0], [0], [1], [0, 0, 1, 1], [], []>} : vector<8x16xf32>, vector<16x8xf32>, vector<8x8xf32> -> vector<8x8xf32>
    %c0_18 = arith.constant 0 : index
    %c0_19 = arith.constant 0 : index
    %23 = vector.load %arg7[%c0_18, %c0_19] : memref<8x2xf32, #tpu.memory_space<vmem>>, vector<8x1xf32>
    %24 = vector.broadcast %23 : vector<8x1xf32> to vector<8x8xf32>
    %25 = arith.mulf %22, %24 : vector<8x8xf32>
    %c0_20 = arith.constant 0 : index
    %c1_21 = arith.constant 1 : index
    %26 = vector.load %arg7[%c0_20, %c1_21] : memref<8x2xf32, #tpu.memory_space<vmem>>, vector<8x1xf32>
    %27 = vector.broadcast %26 : vector<8x1xf32> to vector<8x8xf32>
    %28 = arith.addf %25, %27 : vector<8x8xf32>
    %cst_22 = arith.constant 0.000000e+00 : f32
    %29 = vector.broadcast %cst_22 : f32 to vector<8x8xf32>
    %30 = arith.maximumf %28, %29 : vector<8x8xf32>
    %c0_23 = arith.constant 0 : index
    %c0_24 = arith.constant 0 : index
    %31 = vector.load %arg8[%c0_23, %c0_24] : memref<4x8xf32, #tpu.memory_space<vmem>>, vector<4x8xf32>
    %cst_25 = arith.constant dense<0.000000e+00> : vector<4x8xf32>
    %32 = tpu.matmul %31, %30, %cst_25 {dimension_numbers = #tpu.dot_dimension_numbers<[1], [0], [0], [1], [0, 0, 1, 1], [], []>} : vector<4x8xf32>, vector<8x8xf32>, vector<4x8xf32> -> vector<4x8xf32>
    %c0_26 = arith.constant 0 : index
    %c0_27 = arith.constant 0 : index
    %33 = vector.load %arg9[%c0_26, %c0_27] : memref<4x2xf32, #tpu.memory_space<vmem>>, vector<4x1xf32>
    %34 = vector.broadcast %33 : vector<4x1xf32> to vector<4x8xf32>
    %35 = arith.mulf %32, %34 : vector<4x8xf32>
    %c0_28 = arith.constant 0 : index
    %c1_29 = arith.constant 1 : index
    %36 = vector.load %arg9[%c0_28, %c1_29] : memref<4x2xf32, #tpu.memory_space<vmem>>, vector<4x1xf32>
    %37 = vector.broadcast %36 : vector<4x1xf32> to vector<4x8xf32>
    %38 = arith.addf %35, %37 : vector<4x8xf32>
    %cst_30 = arith.constant 0.000000e+00 : f32
    %39 = vector.broadcast %cst_30 : f32 to vector<4x8xf32>
    %40 = arith.maximumf %38, %39 : vector<4x8xf32>
    %c0_31 = arith.constant 0 : index
    %c0_32 = arith.constant 0 : index
    %41 = vector.load %arg10[%c0_31, %c0_32] : memref<2x4xf32, #tpu.memory_space<vmem>>, vector<2x4xf32>
    %cst_33 = arith.constant dense<0.000000e+00> : vector<2x8xf32>
    %42 = tpu.matmul %41, %40, %cst_33 {dimension_numbers = #tpu.dot_dimension_numbers<[1], [0], [0], [1], [0, 0, 1, 1], [], []>} : vector<2x4xf32>, vector<4x8xf32>, vector<2x8xf32> -> vector<2x8xf32>
    %c0_34 = arith.constant 0 : index
    %c0_35 = arith.constant 0 : index
    %43 = vector.load %arg11[%c0_34, %c0_35] : memref<2x2xf32, #tpu.memory_space<vmem>>, vector<2x1xf32>
    %44 = vector.broadcast %43 : vector<2x1xf32> to vector<2x8xf32>
    %45 = arith.mulf %42, %44 : vector<2x8xf32>
    %c0_36 = arith.constant 0 : index
    %c1_37 = arith.constant 1 : index
    %46 = vector.load %arg11[%c0_36, %c1_37] : memref<2x2xf32, #tpu.memory_space<vmem>>, vector<2x1xf32>
    %47 = vector.broadcast %46 : vector<2x1xf32> to vector<2x8xf32>
    %48 = arith.addf %45, %47 : vector<2x8xf32>
    %cst_38 = arith.constant 0.000000e+00 : f32
    %49 = vector.broadcast %cst_38 : f32 to vector<2x8xf32>
    %50 = arith.maximumf %48, %49 : vector<2x8xf32>
    %c0_39 = arith.constant 0 : index
    %c0_40 = arith.constant 0 : index
    %51 = vector.load %arg12[%c0_39, %c0_40] : memref<1x2xf32, #tpu.memory_space<vmem>>, vector<1x2xf32>
    %cst_41 = arith.constant dense<0.000000e+00> : vector<1x8xf32>
    %52 = tpu.matmul %51, %50, %cst_41 {dimension_numbers = #tpu.dot_dimension_numbers<[1], [0], [0], [1], [0, 0, 1, 1], [], []>} : vector<1x2xf32>, vector<2x8xf32>, vector<1x8xf32> -> vector<1x8xf32>
    %c0_42 = arith.constant 0 : index
    %c0_43 = arith.constant 0 : index
    %53 = vector.load %arg13[%c0_42, %c0_43] : memref<1x2xf32, #tpu.memory_space<vmem>>, vector<1x1xf32>
    %54 = vector.broadcast %53 : vector<1x1xf32> to vector<1x8xf32>
    %55 = arith.mulf %52, %54 : vector<1x8xf32>
    %c0_44 = arith.constant 0 : index
    %c1_45 = arith.constant 1 : index
    %56 = vector.load %arg13[%c0_44, %c1_45] : memref<1x2xf32, #tpu.memory_space<vmem>>, vector<1x1xf32>
    %57 = vector.broadcast %56 : vector<1x1xf32> to vector<1x8xf32>
    %58 = arith.addf %55, %57 : vector<1x8xf32>
    %cst_46 = arith.constant 5.000000e-01 : f32
    %59 = vector.broadcast %cst_46 : f32 to vector<1x8xf32>
    %60 = arith.mulf %59, %58 : vector<1x8xf32>
    %61 = math.tanh %60 : vector<1x8xf32>
    %cst_47 = arith.constant 1.000000e+00 : f32
    %62 = vector.broadcast %cst_47 : f32 to vector<1x8xf32>
    %63 = arith.addf %61, %62 : vector<1x8xf32>
    %cst_48 = arith.constant 5.000000e-01 : f32
    %64 = vector.broadcast %cst_48 : f32 to vector<1x8xf32>
    %65 = arith.mulf %64, %63 : vector<1x8xf32>
    %c0_49 = arith.constant 0 : index
    %c0_50 = arith.constant 0 : index
    %66 = vector.load %arg14[%c0_49, %c0_50] : memref<1x8xf32, #tpu.memory_space<vmem>>, vector<1x8xf32>
    tpu.vector_store %arg14[%c0_49, %c0_50], %65 {strides = array<i32>} : memref<1x8xf32, #tpu.memory_space<vmem>>, vector<1x8xf32>,
    return
  }
  func.func @transform_0(%arg0: i32) -> (i32, i32) {
    %c0_i32 = arith.constant 0 : i32
    %c0_i32_0 = arith.constant 0 : i32
    return %c0_i32, %arg0 : i32, i32
  }
  func.func @transform_1(%arg0: i32) -> (i32, i32) {
    %c0_i32 = arith.constant 0 : i32
    %c0_i32_0 = arith.constant 0 : i32
    %c0_i32_1 = arith.constant 0 : i32
    return %c0_i32, %c0_i32_0 : i32, i32
  }
  func.func @transform_2(%arg0: i32) -> (i32, i32) {
    %c0_i32 = arith.constant 0 : i32
    %c0_i32_0 = arith.constant 0 : i32
    %c0_i32_1 = arith.constant 0 : i32
    return %c0_i32, %c0_i32_0 : i32, i32
  }
  func.func @transform_3(%arg0: i32) -> (i32, i32) {
    %c0_i32 = arith.constant 0 : i32
    %c0_i32_0 = arith.constant 0 : i32
    %c0_i32_1 = arith.constant 0 : i32
    return %c0_i32, %c0_i32_0 : i32, i32
  }
  func.func @transform_4(%arg0: i32) -> (i32, i32) {
    %c0_i32 = arith.constant 0 : i32
    %c0_i32_0 = arith.constant 0 : i32
    %c0_i32_1 = arith.constant 0 : i32
    return %c0_i32, %c0_i32_0 : i32, i32
  }
  func.func @transform_5(%arg0: i32) -> (i32, i32) {
    %c0_i32 = arith.constant 0 : i32
    %c0_i32_0 = arith.constant 0 : i32
    %c0_i32_1 = arith.constant 0 : i32
    return %c0_i32, %c0_i32_0 : i32, i32
  }
  func.func @transform_6(%arg0: i32) -> (i32, i32) {
    %c0_i32 = arith.constant 0 : i32
    %c0_i32_0 = arith.constant 0 : i32
    %c0_i32_1 = arith.constant 0 : i32
    return %c0_i32, %c0_i32_0 : i32, i32
  }
  func.func @transform_7(%arg0: i32) -> (i32, i32) {
    %c0_i32 = arith.constant 0 : i32
    %c0_i32_0 = arith.constant 0 : i32
    %c0_i32_1 = arith.constant 0 : i32
    return %c0_i32, %c0_i32_0 : i32, i32
  }
  func.func @transform_8(%arg0: i32) -> (i32, i32) {
    %c0_i32 = arith.constant 0 : i32
    %c0_i32_0 = arith.constant 0 : i32
    %c0_i32_1 = arith.constant 0 : i32
    return %c0_i32, %c0_i32_0 : i32, i32
  }
  func.func @transform_9(%arg0: i32) -> (i32, i32) {
    %c0_i32 = arith.constant 0 : i32
    %c0_i32_0 = arith.constant 0 : i32
    %c0_i32_1 = arith.constant 0 : i32
    return %c0_i32, %c0_i32_0 : i32, i32
  }
  func.func @transform_10(%arg0: i32) -> (i32, i32) {
    %c0_i32 = arith.constant 0 : i32
    %c0_i32_0 = arith.constant 0 : i32
    %c0_i32_1 = arith.constant 0 : i32
    return %c0_i32, %c0_i32_0 : i32, i32
  }
  func.func @transform_11(%arg0: i32) -> (i32, i32) {
    %c0_i32 = arith.constant 0 : i32
    %c0_i32_0 = arith.constant 0 : i32
    %c0_i32_1 = arith.constant 0 : i32
    return %c0_i32, %c0_i32_0 : i32, i32
  }
  func.func @transform_12(%arg0: i32) -> (i32, i32) {
    %c0_i32 = arith.constant 0 : i32
    %c0_i32_0 = arith.constant 0 : i32
    %c0_i32_1 = arith.constant 0 : i32
    return %c0_i32, %c0_i32_0 : i32, i32
  }
  func.func @transform_13(%arg0: i32) -> (i32, i32) {
    %c0_i32 = arith.constant 0 : i32
    %c0_i32_0 = arith.constant 0 : i32
    return %c0_i32, %arg0 : i32, i32
  }
}

</mosaic_0001>

<bundles_post_ra>
// kernel: tpu_custom_call.1
= control target key start
LH: loop header
LB: loop body
LE: loop exit
PB: predicated region body
PF: predicated region fallthrough
CT: control target
= control target key end

     0   :  { %v448_v2 = vmov 1   ;;  %v449_v5 = vmov 0   ;;  %s619_s0 = inlined_call_operand.vmem [shape: f32[64,8], index: 0, kind: input, shape index: {}]   ;;  %s620_s1 = inlined_call_operand.vmem [shape: f32[32,64], index: 1, kind: input, shape index: {}]   ;;  %s621_s2 = inlined_call_operand.vmem [shape: f32[32,2], index: 2, kind: input, shape index: {}]   ;;  %s622_s3 = inlined_call_operand.vmem [shape: f32[16,32], index: 3, kind: input, shape index: {}]   ;;  %s623_s4 = inlined_call_operand.vmem [shape: f32[16,2], index: 4, kind: input, shape index: {}]   ;;  %s624_s5 = inlined_call_operand.vmem [shape: f32[8,16], index: 5, kind: input, shape index: {}]   ;;  %s625_s6 = inlined_call_operand.vmem [shape: f32[8,2], index: 6, kind: input, shape index: {}]   ;;  %s626_s7 = inlined_call_operand.vmem [shape: f32[4,8], index: 7, kind: input, shape index: {}]   ;;  %s627_s8 = inlined_call_operand.vmem [shape: f32[4,2], index: 8, kind: input, shape index: {}]   ;;  %s628_s9 = inlined_call_operand.vmem [shape: f32[2,4], index: 9, kind: input, shape index: {}]   ;;  %s629_s10 = inlined_call_operand.vmem [shape: f32[2,2], index: 10, kind: input, shape index: {}]   ;;  %s630_s11 = inlined_call_operand.vmem [shape: f32[1,2], index: 11, kind: input, shape index: {}]   ;;  %s631_s12 = inlined_call_operand.vmem [shape: f32[1,2], index: 12, kind: input, shape index: {}]   ;;  %s632_s13 = inlined_call_operand.hbm [shape: f32[1,8], index: 13, kind: output, shape index: {}]  }
   0x1   :  { %v52_v0 = vld [vmem:[%s619_s0 + $0x38] sm:$0xff]  ;;  %v51_v1 = vld [vmem:[%s619_s0 + $0x30] sm:$0xff]  ;;  %408 = vset.pattern.permute.xlu1 %v448_v2  ;;  %v50_v4 = vld [vmem:[%s619_s0 + $0x28] sm:$0xff]  ;;  %407 = vset.pattern.permute.xlu0 %v449_v5 }
   0x2   :  { %78 = vmatpush.msra.mxu0 %v52_v0  ;;  %v102_v3 = vld [vmem:[%s621_s2 + $0x18] sm:$0xff]  ;;  %v49_v6 = vld [vmem:[%s619_s0 + $0x20] sm:$0xff]  ;;  %v101_v7 = vld [vmem:[%s621_s2 + $0x10] sm:$0xff]  ;;  %410 = vset.pattern.permute.xlu2 %v448_v2 }
   0x3   :  { %140 = vperm.xlu1 %408, %v102_v3   ;;  %120 = vperm.xlu0 %407, %v102_v3  }
   0x4   :  { %79 = vmatpush.msra.mxu0 %v51_v1  ;;  %136 = vperm.xlu2 %410, %v101_v7  }
   0x6   :  { %80 = vmatpush.msra.mxu0 %v50_v4 }
   0x7   :  { %18 = vsyncpa [#allocation3], 0  ;;  %v48_v8 = vld [vmem:[%s619_s0 + $0x18] sm:$0xff]  ;;  %v47_v9 = vld [vmem:[%s619_s0 + $0x10] sm:$0xff]  ;;  %vm57_vm0 = vcmask 523264   ;;  %vm153_vm1 = vcmask 261120  }
   0x8   :  { %81 = vmatpush.msra.mxu0 %v49_v6  ;;  %v100_v10 = vld [vmem:[%s621_s2 + $0x8] sm:$0xff]  ;;  %v45_v12 = vld [vmem:[%s619_s0] sm:$0xff]  ;;  %v55_v18 = vld [vmem:[%s620_s1 + $0x10] sm:$0xff]  ;;  %vm210_vm2 = vcmask 130048   ;;  %vm248_vm3 = vcmask 64512   ;;  %vm290_vm4 = vcmask 1043456  }
   0x9   :  { %v46_v11 = vld [vmem:[%s619_s0 + $0x8] sm:$0xff]  ;;  %v53_v13 = vld [vmem:[%s620_s1] sm:$0xff]  ;;  %v56_v19 = vld [vmem:[%s620_s1 + $0x18] sm:$0xff]  ;;  %vm286_vm5 = vcmask 31744   ;;  %vm332_vm6 = vcmask 1041408   ;;  %vm328_vm7 = vcmask 15360  }
   0xa   :  { %82 = vmatpush.msra.mxu0 %v48_v8  ;;  %v99_v14 = vld [vmem:[%s621_s2] sm:$0xff]  ;;  %v184_v15 = vld [vmem:[%s623_s4 + $0x8] sm:$0xff]  ;;  %s383_s20 = sshll.u32 %s632_s13, 4  ;;  %vm374_vm8 = vcmask 57344   ;;  %s384_s20 = int_to_ptr.hbm [resolvable:$true] %s383_s20 }
   0xb   :  { %409 = vset.pattern.permute.xlu1 %v449_v5  ;;  %115 = vperm.xlu0 %407, %v101_v7   ;;  %v54_v16 = vld [vmem:[%s620_s1 + $0x8] sm:$0xff]  ;;  %v183_v17 = vld [vmem:[%s623_s4] sm:$0xff] }
   0xc   :  { %83 = vmatpush.msra.mxu0 %v47_v9  ;;  %110 = vperm.xlu1 %409, %v100_v10   ;;  %v234_v25 = vld [vmem:[%s625_s6] sm:$0xff]  ;;  %v152_v46 = vld [vmem:[%s622_s3 + $0x8] sm:$0xff] }
   0xd   :  { %411 = vset.pattern.permute.xlu2 %v449_v5  ;;  %v151_v45 = vld [vmem:[%s622_s3] sm:$0xff] }
   0xe   :  { %84 = vmatpush.msra.mxu0 %v46_v11  ;;  %105 = vperm.xlu2 %411, %v99_v14   ;;  %v209_v59 = vld [vmem:[%s624_s5] sm:$0xff] }
   0xf   :  { %v272_v60 = vld [vmem:[%s627_s8] sm:$0xf] }
  0x10   :  { %85 = vmatpush.msra.mxu0 %v45_v12  ;;  %v314_v61 = vld [vmem:[%s629_s10] sm:$0x3] }
  0x11   :  { %392 = vmatmul.msk.f32.vlgmr.msra.gmra.mxu0 %vm57_vm0, %v53_v13  ;;  %v356_v6 = vld [vmem:[%s631_s12] sm:$0x1] }
  0x12   :  { %v285_v12 = vld [vmem:[%s628_s9] sm:$0x3]  ;;  %s450_s9 = smov [#allocation2]  }
  0x13   :  { %412 = vset.pattern.permute.xlu0 %v448_v2  ;;  %s381_s18 = sshll.u32 %s450_s9, 4  ;;  %s382_s18 = int_to_ptr.vmem [resolvable:$true] %s381_s18 }
  0x14   :  { %413 = vset.pattern.permute.xlu1 %v448_v2  ;;  %132 = vperm.xlu0 %412, %v100_v10  }
  0x15   :  { %128 = vperm.xlu1 %413, %v99_v14  }
  0x16   :  { %192 = vperm.xlu2 %411, %v184_v15  }
  0x19   :  { %393 = vmatmul.msk.f32.gmra.mxu0 %vm57_vm0, %v54_v16 }
  0x1c   :  { %198 = vperm.xlu0 %412, %v183_v17  }
  0x1d   :  { %414 = vset.pattern.permute.xlu1 %v449_v5 }
  0x1e   :  { %187 = vperm.xlu1 %414, %v183_v17   ;;  %415 = vset.pattern.permute.xlu2 %v448_v2 }
  0x1f   :  { %202 = vperm.xlu2 %415, %v184_v15  }
  0x21   :  { %394 = vmatmul.msk.f32.gmra.mxu0 %vm57_vm0, %v55_v18 }
  0x24   :  { %416 = vset.pattern.permute.xlu0 %v449_v5 }
  0x25   :  { %275 = vperm.xlu0 %416, %v272_v60  }
  0x26   :  { %237 = vperm.xlu1 %414, %v234_v25  }
  0x27   :  { %242 = vperm.xlu2 %415, %v234_v25  }
  0x29   :  { %395 = vmatmul.msk.f32.gmra.mxu0 %vm57_vm0, %v56_v19  ;;  %v327_v19 = vld [vmem:[%s630_s11] sm:$0x1] }
  0x2d   :  { %419 = vset.pattern.permute.xlu0 %v448_v2 }
  0x2e   :  { %417 = vset.pattern.permute.xlu1 %v448_v2  ;;  %365 = vperm.xlu0 %419, %v356_v6  }
  0x2f   :  { %418 = vset.pattern.permute.xlu2 %v449_v5  ;;  %280 = vperm.xlu1 %417, %v272_v60   ;;  %v247_v5 = vld [vmem:[%s626_s7] sm:$0xf] }
  0x30   :  { %317 = vperm.xlu2 %418, %v314_v61  }
  0x37   :  { %322 = vperm.xlu1 %417, %v314_v61  }
  0x38   :  { %359 = vperm.xlu2 %418, %v356_v6  }
  0x5e   :  { %v137_v24 = vpop.permute.xlu2 %136 }
  0x68   :  { %v106_v30 = vpop.permute.xlu2 %105 }
  0x70   :  { %v193_v48 = vpop.permute.xlu2 %192 }
  0x75   :  { %v121_v21 = vpop.permute.xlu0 %120  ;;  %v141_v22 = vpop.permute.xlu1 %140 }
  0x79   :  { %v203_v54 = vpop.permute.xlu2 %202 }
  0x7d   :  { %v116_v26 = vpop.permute.xlu0 %115 }
  0x7e   :  { %v111_v28 = vpop.permute.xlu1 %110 }
  0x81   :  { %v243_v1 = vpop.permute.xlu2 %242 }
  0x86   :  { %v133_v34 = vpop.permute.xlu0 %132 }
  0x87   :  { %v129_v38 = vpop.permute.xlu1 %128 }
  0x8a   :  { %v318_v13 = vpop.permute.xlu2 %317 }
  0x8e   :  { %v87_v20 = vpop.f32.mrf.mxu0  ;;  %v199_v53 = vpop.permute.xlu0 %198 }
  0x8f   :  { %v123_v35 = vmul.f32 %v106_v30, %v87_v20 }
  0x90   :  { %v188_v49 = vpop.permute.xlu1 %187 }
  0x91   :  { %v143_v41 = vadd.f32 %v129_v38, %v123_v35 }
  0x92   :  { %v360_v20 = vpop.permute.xlu2 %359 }
  0x93   :  { %v147_v44 = vmax.f32 %v143_v41, 0.0 }
  0x96   :  { %v90_v23 = vpop.f32.mrf.mxu0 }
  0x97   :  { %v124_v32 = vmul.f32 %v111_v28, %v90_v23  ;;  %v276_v2 = vpop.permute.xlu0 %275 }
  0x98   :  { %v238_v62 = vpop.permute.xlu1 %237 }
  0x99   :  { %v144_v39 = vadd.f32 %v133_v34, %v124_v32 }
  0x9b   :  { %v148_v43 = vmax.f32 %v144_v39, 0.0 }
  0x9e   :  { %v93_v27 = vpop.f32.mrf.mxu0 }
  0x9f   :  { %v125_v29 = vmul.f32 %v116_v26, %v93_v27 }
  0xa1   :  { %v145_v37 = vadd.f32 %v137_v24, %v125_v29  ;;  %v281_v9 = vpop.permute.xlu1 %280 }
  0xa3   :  { %v149_v42 = vmax.f32 %v145_v37, 0.0 }
  0xa6   :  { %v96_v31 = vpop.f32.mrf.mxu0 }
  0xa7   :  { %v126_v33 = vmul.f32 %v121_v21, %v96_v31  ;;  %v366_v21 = vpop.permute.xlu0 %365 }
  0xa8   :  { %v368_v23 = vperm.slane %v366_v21, 0 }
  0xa9   :  { %v146_v36 = vadd.f32 %v141_v22, %v126_v33  ;;  %v323_v16 = vpop.permute.xlu1 %322  ;;  %v362_v22 = vperm.slane %v360_v20, 0 }
  0xab   :  { %v150_v40 = vmax.f32 %v146_v36, 0.0 }
  0xad   :  { %172 = vmatpush.msra.mxu1 %v150_v40 }
  0xaf   :  { %173 = vmatpush.msra.mxu1 %v149_v42 }
  0xb1   :  { %174 = vmatpush.msra.mxu1 %v148_v43 }
  0xb3   :  { %175 = vmatpush.msra.mxu1 %v147_v44 }
  0xb4   :  { %396 = vmatmul.msk.f32.vlgmr.msra.gmra.mxu1 %vm153_vm1, %v151_v45 }
  0xbc   :  { %397 = vmatmul.msk.f32.gmra.mxu1 %vm153_vm1, %v152_v46 }
 0x131   :  { %v177_v47 = vpop.f32.mrf.mxu1 }
 0x132   :  { %v195_v50 = vmul.f32 %v188_v49, %v177_v47 }
 0x134   :  { %v205_v56 = vadd.f32 %v199_v53, %v195_v50 }
 0x136   :  { %v207_v58 = vmax.f32 %v205_v56, 0.0 }
 0x139   :  { %v180_v51 = vpop.f32.mrf.mxu1 }
 0x13a   :  { %v196_v52 = vmul.f32 %v193_v48, %v180_v51 }
 0x13c   :  { %v206_v55 = vadd.f32 %v203_v54, %v196_v52 }
 0x13e   :  { %v208_v57 = vmax.f32 %v206_v55, 0.0 }
 0x140   :  { %228 = vmatpush.msra.mxu2 %v208_v57 }
 0x142   :  { %229 = vmatpush.msra.mxu2 %v207_v58 }
 0x143   :  { %398 = vmatmul.msk.f32.vlgmr.msra.gmra.mxu2 %vm210_vm2, %v209_v59 }
 0x1c6   :  { %v231_v63 = vpop.f32.mrf.mxu2 }
 0x1c7   :  { %v240_v0 = vmul.f32 %v238_v62, %v231_v63 }
 0x1c9   :  { %v245_v3 = vadd.f32 %v243_v1, %v240_v0 }
 0x1cb   :  { %v246_v4 = vmax.f32 %v245_v3, 0.0 }
 0x1cd   :  { %267 = vmatpush.msra.mxu3 %v246_v4 }
 0x1ce   :  { %399 = vmatmul.msk.f32.vlgmr.msra.gmra.mxu3 %vm248_vm3, %v247_v5 }
 0x251   :  { %v269_v7 = vpop.f32.mrf.mxu3 }
 0x252   :  { %v278_v8 = vmul.f32 %v276_v2, %v269_v7 }
 0x254   :  { %v283_v10 = vadd.f32 %v281_v9, %v278_v8 }
 0x256   :  { %v284_v11 = vmax.f32 %v283_v10, 0.0 }
 0x258   :  { %400 = vmatpush.msk.msrb.mxu3 %vm290_vm4, %v284_v11 }
 0x259   :  { %401 = vmatmul.msk.f32.vlgmr.msrb.gmra.mxu3 %vm286_vm5, %v285_v12 }
 0x2dc   :  { %v311_v14 = vpop.f32.mrf.mxu3 }
 0x2dd   :  { %v320_v15 = vmul.f32 %v318_v13, %v311_v14 }
 0x2df   :  { %v325_v17 = vadd.f32 %v323_v16, %v320_v15 }
 0x2e1   :  { %v326_v18 = vmax.f32 %v325_v17, 0.0 }
 0x2e3   :  { %402 = vmatpush.msk.msrb.mxu2 %vm332_vm6, %v326_v18 }
 0x2e4   :  { %403 = vmatmul.msk.f32.vlgmr.msrb.gmra.mxu2 %vm328_vm7, %v327_v19 }
 0x367   :  { %v353_v24 = vpop.f32.mrf.mxu2 }
 0x368   :  { %v363_v25 = vmul.f32 %v362_v22, %v353_v24 }
 0x36a   :  { %v369_v26 = vadd.f32 %v368_v23, %v363_v25 }
 0x36c   :  { %v370_v27 = vmul.f32 0.5, %v369_v26 }
 0x36e   :  { %420 = vtanh.f32 %v370_v27 }
 0x374   :  { %v421_v28 = vpop.eup %420 }
 0x375   :  { %v372_v29 = vadd.f32 1.0, %v421_v28 }
 0x377   :  { %v373_v30 = vmul.f32 0.5, %v372_v29 }
 0x379   :  { %375 = vst.msk [vmem:[#allocation2] sm:$0x1] %vm374_vm8, %v373_v30 }
 0x37a   :  { %386 = dma.vmem_to_hbm [thread:$0]  %s382_s18, 16, %s384_s20, [#allocation3]  }
 0x37b   :  { %446 = dma.done.wait [#allocation3], 16  }
 0x37c   :  { %447 = vsyncadd [#allocation3], 4294967280 }
 0x37d   :  { %391 = vsyncpa [#allocation3], 1 }

</bundles_post_ra>
